<compile_context>
chip_gen: v7x
topology: tpu7x:2x2x1
jax: 0.10.0
libtpu: 0.0.40
codegen_flags: <defaults>
</compile_context>

<pallas_src>
import math

import jax
import jax.numpy as jnp
import numpy as np
from jax.experimental import pallas as pl
from jax.experimental.pallas import tpu as pltpu


def _attention_kernel(x_ref, q_ref, wq_ref, wkv_ref, bd_ref, o_ref):
    """Fused projections + per-head softmax attention on one row tile.

    x_ref/q_ref : (TR, IN)   prev-seq / query rows (possibly G-row-folded).
    wq_ref      : (IN, EG)   query weight with 1/sqrt(E) pre-folded.
    wkv_ref     : (IN, 2*EG) [head-summed Wk | head-summed Wv], lane-broadcast.
    bd_ref      : (EG, EG)   block-diagonal ones (D x D) -> per-head sums.
    o_ref       : (TR, EG)   output rows.
    """
    w_dt = wq_ref.dtype
    eg = wq_ref.shape[1]

    # Cast to the matmul dtype inside the kernel (hidden under the tile DMA).
    x = x_ref[...].astype(w_dt)
    q = q_ref[...].astype(w_dt)

    # Two MXU matmuls; K and V never materialize (head sums folded into the
    # weights) and the fused Wk|Wv gives a 256-wide result per pass.
    qs = jnp.dot(q, wq_ref[...], preferred_element_type=jnp.float32)
    kv = jnp.dot(x, wkv_ref[...], preferred_element_type=jnp.float32)
    ksum = kv[:, :eg]            # lane-aligned slice (eg is a multiple of 128)
    vsum = kv[:, eg:]

    a = qs * ksum                                  # logits (scale folded into Wq)
    # Shared row max: a constant shift within every D-lane softmax group, so
    # the softmax stays exact while exp() cannot overflow.
    m = jnp.max(a, axis=-1, keepdims=True)
    e = jnp.exp(a - m)
    # Per-head denominators via one block-diag-ones matmul, already broadcast
    # across each head's lanes.  Runs in the matmul dtype (bf16 when the user
    # opted in -> cheap on v5e's multi-pass f32 MXU), f32-exact by default.
    denom = jnp.dot(e.astype(w_dt), bd_ref[...], preferred_element_type=jnp.float32)
    denom = jnp.maximum(denom, 1e-30)              # only hit if e underflowed to 0
    p = e * pl.reciprocal(denom, approx=True)      # EUP slot, ~free
    o_ref[...] = (p * vsum).astype(o_ref.dtype)


def _round_up(x, m):
    return ((x + m - 1) // m) * m


def temporal_self_attention(prev_seq, query, wq_t, wk_t, wv_t, heads, *,
                            tile_rows=2048, matmul_dtype=None, out_dtype=None):
    """prev_seq, query: (N, E). wq_t/wk_t/wv_t: (E, E), already (in, out)-transposed.

    matmul_dtype=jnp.bfloat16 halves weight traffic and doubles MXU rate on
    v6e/v7x (softmax math stays f32); out_dtype=jnp.bfloat16 halves writeback.
    """
    N, E = query.shape
    assert prev_seq.shape == (N, E)
    D = E // heads
    assert D * heads == E, "embed_size must be divisible by heads"

    # ---- lane layout: make the kernel's output width a multiple of 128 ----
    if E % 128 == 0:
        G, E_pad = 1, E                          # already lane-dense
    elif E < 128 and 128 % E == 0:
        G, E_pad = 128 // E, E                   # fold G tokens per lane-row
    else:
        G, E_pad = 1, _round_up(E, 128)          # dummy zero "head" lanes
    EG = G * E_pad                               # kernel output width
    in_width = G * E                             # kernel input width (no lane pad)

    w_dt = jnp.dtype(matmul_dtype) if matmul_dtype is not None else jnp.dtype(query.dtype)
    o_dt = jnp.dtype(out_dtype) if out_dtype is not None else jnp.dtype(query.dtype)

    # ---- one-time weight folding (wrapper-side, exact by linearity) --------
    scale = 1.0 / math.sqrt(E)
    wq_f = jnp.asarray(wq_t, jnp.float32) * scale                             # (E, E)
    wk_sum = jnp.asarray(wk_t, jnp.float32).reshape(E, heads, D).sum(axis=1)  # (E, D)
    wv_sum = jnp.asarray(wv_t, jnp.float32).reshape(E, heads, D).sum(axis=1)  # (E, D)
    wk_f = jnp.tile(wk_sum, (1, heads))                                       # (E, E)
    wv_f = jnp.tile(wv_sum, (1, heads))                                       # (E, E)
    if E_pad != E:                               # zero-pad weight *output* columns
        pad = ((0, 0), (0, E_pad - E))
        wq_f = jnp.pad(wq_f, pad)
        wk_f = jnp.pad(wk_f, pad)
        wv_f = jnp.pad(wv_f, pad)
    if G > 1:                                    # block-diag replicate per fold group
        eye_g = jnp.eye(G, dtype=jnp.float32)
        wq_f = jnp.kron(eye_g, wq_f)
        wk_f = jnp.kron(eye_g, wk_f)
        wv_f = jnp.kron(eye_g, wv_f)
    wq_f = wq_f.astype(w_dt)                                     # (in_width, EG)
    wkv_f = jnp.concatenate([wk_f, wv_f], axis=1).astype(w_dt)   # (in_width, 2*EG)
    # Block-diag ones: same D-block -> 1.  Fold groups start at multiples of E
    # (a multiple of D) and pad lanes sit past heads*D, so heads stay isolated.
    blk = np.arange(EG) // D
    bd = jnp.asarray((blk[:, None] == blk[None, :]).astype(np.float32)).astype(w_dt)

    # ---- activations: no dtype/pad copies beyond the 8-row sublane multiple
    rows = -(-N // G)                            # folded rows needed
    rows8 = _round_up(max(rows, 1), 8)
    n_need = rows8 * G

    def fold(arr):
        if n_need != N:
            arr = jnp.pad(arr, ((0, n_need - N), (0, 0)))   # zero rows -> sliced off
        return arr.reshape(rows8, in_width)                  # contiguous reshape

    x_f = fold(prev_seq)
    q_f = fold(query)

    # ---- row tile: large (amortize ~0.35us/step), but keep >= 2 grid steps
    # so the "parallel" axis can shard across v7x's two TensorCores.
    tile_r = min(int(tile_rows), max(8, _round_up(-(-rows8 // 2), 8)))
    tile_r = _round_up(tile_r, 8)

    in_b = max(jnp.dtype(prev_seq.dtype).itemsize, jnp.dtype(query.dtype).itemsize)
    w_b = jnp.dtype(w_dt).itemsize
    o_b = jnp.dtype(o_dt).itemsize
    w_bytes = (in_width * EG + in_width * 2 * EG + EG * EG) * w_b
    single_buf_w = w_bytes > (2 << 20)           # single-buffer big constant weights

    def vmem_need(tr):
        return (w_bytes * (1 if single_buf_w else 2)      # constant-index weights
                + 2 * 2 * tr * in_width * in_b            # x/q tiles, double-buffered
                + 2 * tr * EG * o_b                       # output tile, double-buffered
                + 8 * tr * EG * 4)                        # f32 elementwise intermediates

    budget = 40 * 1024 * 1024                    # headroom under v7x's 64 MiB VMEM
    while tile_r > 8 and vmem_need(tile_r) > budget:
        tile_r = max(8, _round_up(tile_r // 2, 8))
    vmem_limit = int(min(48 * 1024 * 1024,
                         max(32 * 1024 * 1024, vmem_need(tile_r) + (4 << 20))))

    grid = (pl.cdiv(rows8, tile_r),)

    def w_spec(shape):
        if single_buf_w:
            # Constant-index weights don't need two buffers; saves VMEM for big E.
            return pl.BlockSpec(shape, lambda i: (0, 0), pipeline_mode=pl.Buffered(1))
        return pl.BlockSpec(shape, lambda i: (0, 0))

    out_f = pl.pallas_call(
        _attention_kernel,
        out_shape=jax.ShapeDtypeStruct((rows8, EG), o_dt),
        grid_spec=pltpu.PrefetchScalarGridSpec(
            num_scalar_prefetch=0,
            grid=grid,
            in_specs=[
                pl.BlockSpec((tile_r, in_width), lambda i: (i, 0)),  # prev_seq rows
                pl.BlockSpec((tile_r, in_width), lambda i: (i, 0)),  # query rows
                w_spec((in_width, EG)),                              # Wq * 1/sqrt(E)
                w_spec((in_width, 2 * EG)),                          # [Wk_sum | Wv_sum]
                w_spec((EG, EG)),                                    # block-diag ones
            ],
            out_specs=pl.BlockSpec((tile_r, EG), lambda i: (i, 0)),
        ),
        compiler_params=pltpu.CompilerParams(
            dimension_semantics=("parallel",),
            vmem_limit_bytes=vmem_limit,
        ),
    )(x_f, q_f, wq_f, wkv_f, bd)

    out = out_f.reshape(rows8 * G, E_pad)
    return out[:N, :E]


def reference(prev_seq, query, wq_t, wk_t, wv_t, heads):
    """Pure-JAX mirror of the PyTorch forward, for correctness checking."""
    N, E = query.shape
    D = E // heads
    V = (prev_seq @ wv_t).reshape(N, heads, D)
    K = (prev_seq @ wk_t).reshape(N, heads, D)
    Q = (query @ wq_t).reshape(N, heads, D)
    att = Q * K.sum(axis=1, keepdims=True)                  # einsum('nqd,nkd->nqd')
    att = jax.nn.softmax(att / math.sqrt(E), axis=-1)
    out = att * V.sum(axis=1, keepdims=True)                # einsum('nsd,nvd->nsd')
    return out.reshape(N, E)


if __name__ == "__main__":
    embed_size = 32
    heads = 4
    N = 16  # (flattened) tokens; prev_seq / query are (N, embed_size)

    key = jax.random.PRNGKey(0)
    k_prev, k_qry, k_wq, k_wk, k_wv = jax.random.split(key, 5)

    prev_seq = jax.random.normal(k_prev, (N, embed_size), dtype=jnp.float32)
    query = jax.random.normal(k_qry, (N, embed_size), dtype=jnp.float32)

    # PyTorch nn.Linear weights are (out_features, in_features); y = x @ W.T.
    bound = 1.0 / math.sqrt(embed_size)
    wq_pt = jax.random.uniform(k_wq, (embed_size, embed_size), jnp.float32, -bound, bound)
    wk_pt = jax.random.uniform(k_wk, (embed_size, embed_size), jnp.float32, -bound, bound)
    wv_pt = jax.random.uniform(k_wv, (embed_size, embed_size), jnp.float32, -bound, bound)
    wq_t, wk_t, wv_t = wq_pt.T, wk_pt.T, wv_pt.T

    # Config 1: default tiles, fully f32 path.
    out = jax.block_until_ready(
        temporal_self_attention(prev_seq, query, wq_t, wk_t, wv_t, heads))
    ref = reference(prev_seq, query, wq_t, wk_t, wv_t, heads)
    np.testing.assert_allclose(np.asarray(out), np.asarray(ref), atol=2e-3, rtol=2e-3)

    # Config 2: ragged N -> row-fold padding + multi-step grid with a ragged
    # (cdiv) last tile.
    N2 = 70
    kp2, kq2 = jax.random.split(jax.random.PRNGKey(1), 2)
    prev2 = jax.random.normal(kp2, (N2, embed_size), dtype=jnp.float32)
    qry2 = jax.random.normal(kq2, (N2, embed_size), dtype=jnp.float32)
    out2 = jax.block_until_ready(
        temporal_self_attention(prev2, qry2, wq_t, wk_t, wv_t, heads))
    ref2 = reference(prev2, qry2, wq_t, wk_t, wv_t, heads)
    np.testing.assert_allclose(np.asarray(out2), np.asarray(ref2), atol=2e-3, rtol=2e-3)

    # Config 3: opt-in bf16 MXU path + bf16 writeback (loose tolerance).
    out3 = jax.block_until_ready(
        temporal_self_attention(prev2, qry2, wq_t, wk_t, wv_t, heads,
                                matmul_dtype=jnp.bfloat16, out_dtype=jnp.bfloat16))
    np.testing.assert_allclose(np.asarray(out3).astype(np.float32), np.asarray(ref2),
                               atol=1e-1, rtol=1e-1)

    print("KERNEL_OK")
</pallas_src>

<mosaic_0001>
module attributes {stable_mosaic.version = 11 : i64} {
  func.func @_attention_kernel(%arg0: i32, %arg1: memref<8x128xf32, #tpu.memory_space<vmem>>, %arg2: memref<8x128xf32, #tpu.memory_space<vmem>>, %arg3: memref<128x128xf32, #tpu.memory_space<vmem>>, %arg4: memref<128x256xf32, #tpu.memory_space<vmem>>, %arg5: memref<128x128xf32, #tpu.memory_space<vmem>>, %arg6: memref<8x128xf32, #tpu.memory_space<vmem>>) attributes {dimension_semantics = [#tpu.dimension_semantics<parallel>], iteration_bounds = array<i64: 1>, scalar_prefetch = 0 : i64, scratch_operands = 0 : i64, tpu.core_type = #tpu.core_type<tc>, window_params = [{transform_indices = @transform_0, window_bounds = array<i64: 8, 128>}, {transform_indices = @transform_1, window_bounds = array<i64: 8, 128>}, {pipeline_mode = #tpu.pipeline_mode<synchronous>, transform_indices = @transform_2, window_bounds = array<i64: 128, 128>}, {pipeline_mode = #tpu.pipeline_mode<synchronous>, transform_indices = @transform_3, window_bounds = array<i64: 128, 256>}, {pipeline_mode = #tpu.pipeline_mode<synchronous>, transform_indices = @transform_4, window_bounds = array<i64: 128, 128>}, {transform_indices = @transform_5, window_bounds = array<i64: 8, 128>}]} {
    %c0 = arith.constant 0 : index
    %c0_0 = arith.constant 0 : index
    %0 = vector.load %arg1[%c0, %c0_0] : memref<8x128xf32, #tpu.memory_space<vmem>>, vector<8x128xf32>
    %c0_1 = arith.constant 0 : index
    %c0_2 = arith.constant 0 : index
    %1 = vector.load %arg2[%c0_1, %c0_2] : memref<8x128xf32, #tpu.memory_space<vmem>>, vector<8x128xf32>
    %c0_3 = arith.constant 0 : index
    %c0_4 = arith.constant 0 : index
    %2 = vector.load %arg3[%c0_3, %c0_4] : memref<128x128xf32, #tpu.memory_space<vmem>>, vector<128x128xf32>
    %cst = arith.constant dense<0.000000e+00> : vector<8x128xf32>
    %3 = tpu.matmul %1, %2, %cst {dimension_numbers = #tpu.dot_dimension_numbers<[1], [0], [0], [1], [0, 0, 1, 1], [], []>} : vector<8x128xf32>, vector<128x128xf32>, vector<8x128xf32> -> vector<8x128xf32>
    %c0_5 = arith.constant 0 : index
    %c0_6 = arith.constant 0 : index
    %4 = vector.load %arg4[%c0_5, %c0_6] : memref<128x256xf32, #tpu.memory_space<vmem>>, vector<128x256xf32>
    %cst_7 = arith.constant dense<0.000000e+00> : vector<8x256xf32>
    %5 = tpu.matmul %0, %4, %cst_7 {dimension_numbers = #tpu.dot_dimension_numbers<[1], [0], [0], [1], [0, 0, 1, 1], [], []>} : vector<8x128xf32>, vector<128x256xf32>, vector<8x256xf32> -> vector<8x256xf32>
    %6 = vector.extract_strided_slice %5 {offsets = [0, 0], sizes = [8, 128], strides = [1, 1]} : vector<8x256xf32> to vector<8x128xf32>
    %7 = vector.extract_strided_slice %5 {offsets = [0, 128], sizes = [8, 128], strides = [1, 1]} : vector<8x256xf32> to vector<8x128xf32>
    %8 = arith.mulf %3, %6 : vector<8x128xf32>
    %cst_8 = arith.constant dense<0xFF800000> : vector<8xf32>
    %9 = vector.multi_reduction <maximumf>, %8, %cst_8 [1] : vector<8x128xf32> to vector<8xf32>
    %10 = vector.shape_cast %9 : vector<8xf32> to vector<8x1xf32>
    %11 = vector.broadcast %10 : vector<8x1xf32> to vector<8x128xf32>
    %12 = arith.subf %8, %11 : vector<8x128xf32>
    %13 = math.exp %12 : vector<8x128xf32>
    %c0_9 = arith.constant 0 : index
    %c0_10 = arith.constant 0 : index
    %14 = vector.load %arg5[%c0_9, %c0_10] : memref<128x128xf32, #tpu.memory_space<vmem>>, vector<128x128xf32>
    %cst_11 = arith.constant dense<0.000000e+00> : vector<8x128xf32>
    %15 = tpu.matmul %13, %14, %cst_11 {dimension_numbers = #tpu.dot_dimension_numbers<[1], [0], [0], [1], [0, 0, 1, 1], [], []>} : vector<8x128xf32>, vector<128x128xf32>, vector<8x128xf32> -> vector<8x128xf32>
    %cst_12 = arith.constant 1.000000e-30 : f32
    %16 = vector.broadcast %cst_12 : f32 to vector<8x128xf32>
    %17 = arith.maximumf %15, %16 : vector<8x128xf32>
    %18 = tpu.reciprocal %17 {approx = true} : vector<8x128xf32> -> vector<8x128xf32>
    %19 = arith.mulf %13, %18 : vector<8x128xf32>
    %20 = arith.mulf %19, %7 : vector<8x128xf32>
    %c0_13 = arith.constant 0 : index
    %c0_14 = arith.constant 0 : index
    %21 = vector.load %arg6[%c0_13, %c0_14] : memref<8x128xf32, #tpu.memory_space<vmem>>, vector<8x128xf32>
    tpu.vector_store %arg6[%c0_13, %c0_14], %20 {strides = array<i32>} : memref<8x128xf32, #tpu.memory_space<vmem>>, vector<8x128xf32>,
    return
  }
  func.func @transform_0(%arg0: i32) -> (i32, i32) {
    %c0_i32 = arith.constant 0 : i32
    %c0_i32_0 = arith.constant 0 : i32
    return %arg0, %c0_i32 : i32, i32
  }
  func.func @transform_1(%arg0: i32) -> (i32, i32) {
    %c0_i32 = arith.constant 0 : i32
    %c0_i32_0 = arith.constant 0 : i32
    return %arg0, %c0_i32 : i32, i32
  }
  func.func @transform_2(%arg0: i32) -> (i32, i32) {
    %c0_i32 = arith.constant 0 : i32
    %c0_i32_0 = arith.constant 0 : i32
    %c0_i32_1 = arith.constant 0 : i32
    return %c0_i32, %c0_i32_0 : i32, i32
  }
  func.func @transform_3(%arg0: i32) -> (i32, i32) {
    %c0_i32 = arith.constant 0 : i32
    %c0_i32_0 = arith.constant 0 : i32
    %c0_i32_1 = arith.constant 0 : i32
    return %c0_i32, %c0_i32_0 : i32, i32
  }
  func.func @transform_4(%arg0: i32) -> (i32, i32) {
    %c0_i32 = arith.constant 0 : i32
    %c0_i32_0 = arith.constant 0 : i32
    %c0_i32_1 = arith.constant 0 : i32
    return %c0_i32, %c0_i32_0 : i32, i32
  }
  func.func @transform_5(%arg0: i32) -> (i32, i32) {
    %c0_i32 = arith.constant 0 : i32
    %c0_i32_0 = arith.constant 0 : i32
    return %arg0, %c0_i32 : i32, i32
  }
}

</mosaic_0001>

<bundles_post_ra>
// kernel: tpu_custom_call.1
= control target key start
LH: loop header
LB: loop body
LE: loop exit
PB: predicated region body
PF: predicated region fallthrough
CT: control target
= control target key end

     0   :  { %10 = vsyncpa [#allocation3], 0  ;;  %s881_s0 = inlined_call_operand.hbm [shape: f32[8,128], index: 0, kind: input, shape index: {}]   ;;  %s882_s1 = inlined_call_operand.hbm [shape: f32[8,128], index: 1, kind: input, shape index: {}]   ;;  %s883_s2 = inlined_call_operand.hbm [shape: f32[128,128], index: 2, kind: input, shape index: {}]   ;;  %s884_s3 = inlined_call_operand.hbm [shape: f32[128,256], index: 3, kind: input, shape index: {}]   ;;  %s885_s4 = inlined_call_operand.hbm [shape: f32[128,128], index: 4, kind: input, shape index: {}]   ;;  %s886_s5 = inlined_call_operand.hbm [shape: f32[8,128], index: 5, kind: output, shape index: {}]  }
   0x1   :  { %11 = vsyncpa [#allocation6], 0 }
   0x2   :  { %12 = vsyncpa [#allocation9], 0 }
   0x3   :  { %13 = vsyncpa [#allocation4], 0  ;;  %s731_s18 = smov [#allocation5]   ;;  %s732_s20 = smov [#allocation8]  }
   0x4   :  { %s30_s19 = sshll.u32 %s731_s18, 4  ;;  %s51_s21 = sshll.u32 %s732_s20, 4  ;;  %s31_s19 = int_to_ptr.vmem [resolvable:$true] %s30_s19  ;;  %s774_s21 = int_to_ptr.vmem [resolvable:$true] %s51_s21 }
   0x5   :  { %s591_s24 = scalar_lea.hbm %s882_s1, 128 }
   0x6   :  { %p592_p0 = scmp.ne.s32.totalorder %s882_s1, %s591_s24  ;;  %p595_p1 = scmp.lt.u32.totalorder %s591_s24, %s882_s1 }
   0x8   :  { %p597_p2 = pnand %p595_p1, %p592_p0 }
   0xa   :  { %600 = shalt.err (!%p597_p2)
}
   0xb   :  { %s601_s29 = scalar_lea.vmem %s31_s19, 128  ;;  %p606_p4 = scmp.lt.s32.totalorder %s31_s19, %s31_s19 }
   0xc   :  { %p602_p3 = scmp.ne.s32.totalorder %s31_s19, %s601_s29  ;;  %p607_p5 = scmp.lt.s32.totalorder %s601_s29, %s601_s29 }
   0xe   :  { %p608_p6 = por %p607_p5, %p606_p4 }
  0x10   :  { %p609_p7 = pnand %p608_p6, %p602_p3 }
  0x12   :  { %612 = shalt.err (!%p609_p7)
}
  0x13   :  { %33 = dma.hbm_to_vmem [thread:$0]  %s882_s1, 128, %s31_s19, [#allocation6]  }
  0x14   :  { %s613_s9 = scalar_lea.hbm %s884_s3, 4096 }
  0x15   :  { %p614_p8 = scmp.ne.s32.totalorder %s884_s3, %s613_s9  ;;  %p617_p9 = scmp.lt.u32.totalorder %s613_s9, %s884_s3 }
  0x17   :  { %p619_p10 = pnand %p617_p9, %p614_p8 }
  0x19   :  { %622 = shalt.err (!%p619_p10)
}
  0x1a   :  { %s623_s14 = scalar_lea.vmem %s774_s21, 4096  ;;  %p628_p12 = scmp.lt.s32.totalorder %s774_s21, %s774_s21 }
  0x1b   :  { %p624_p11 = scmp.ne.s32.totalorder %s774_s21, %s623_s14  ;;  %p629_p13 = scmp.lt.s32.totalorder %s623_s14, %s623_s14 }
  0x1d   :  { %p630_p0 = por %p629_p13, %p628_p12 }
  0x1f   :  { %p631_p1 = pnand %p630_p0, %p624_p11 }
  0x21   :  { %634 = shalt.err (!%p631_p1)
}
  0x22   :  { %s733_s1 = smov 256   ;;  %s734_s15 = smov 16  }
  0x23   :  { %57 = dma.hbm_to_vmem [thread:$0]  %s884_s3, 4096, %s774_s21, [#allocation9], %s733_s1, %s733_s1, %s734_s15  }
  0x24   :  { %s735_s18 = smov [#allocation2]   ;;  %s736_s20 = smov [#allocation7]  }
  0x25   :  { %s20_s19 = sshll.u32 %s735_s18, 4  ;;  %s39_s22 = sshll.u32 %s736_s20, 4  ;;  %s21_s19 = int_to_ptr.vmem [resolvable:$true] %s20_s19  ;;  %s805_s22 = int_to_ptr.vmem [resolvable:$true] %s39_s22 }
  0x26   :  { %s635_s25 = scalar_lea.hbm %s881_s0, 128 }
  0x27   :  { %p636_p2 = scmp.ne.s32.totalorder %s881_s0, %s635_s25  ;;  %p639_p3 = scmp.lt.u32.totalorder %s635_s25, %s881_s0 }
  0x29   :  { %p641_p4 = pnand %p639_p3, %p636_p2 }
  0x2b   :  { %644 = shalt.err (!%p641_p4)
}
  0x2c   :  { %s645_s3 = scalar_lea.vmem %s21_s19, 128  ;;  %p650_p6 = scmp.lt.s32.totalorder %s21_s19, %s21_s19 }
  0x2d   :  { %p646_p5 = scmp.ne.s32.totalorder %s21_s19, %s645_s3  ;;  %p651_p7 = scmp.lt.s32.totalorder %s645_s3, %s645_s3 }
  0x2f   :  { %p652_p8 = por %p651_p7, %p650_p6 }
  0x31   :  { %p653_p9 = pnand %p652_p8, %p646_p5 }
  0x33   :  { %656 = shalt.err (!%p653_p9)
}
  0x34   :  { %23 = dma.hbm_to_vmem [thread:$0]  %s881_s0, 128, %s21_s19, [#allocation3]  }
  0x35   :  { %s657_s8 = scalar_lea.hbm %s883_s2, 2048 }
  0x36   :  { %p658_p10 = scmp.ne.s32.totalorder %s883_s2, %s657_s8  ;;  %p661_p11 = scmp.lt.u32.totalorder %s657_s8, %s883_s2 }
  0x38   :  { %p663_p12 = pnand %p661_p11, %p658_p10 }
  0x3a   :  { %666 = shalt.err (!%p663_p12)
}
  0x3b   :  { %s667_s13 = scalar_lea.vmem %s805_s22, 2048  ;;  %p672_p0 = scmp.lt.s32.totalorder %s805_s22, %s805_s22 }
  0x3c   :  { %p668_p13 = scmp.ne.s32.totalorder %s805_s22, %s667_s13  ;;  %p673_p1 = scmp.lt.s32.totalorder %s667_s13, %s667_s13 }
  0x3e   :  { %p674_p2 = por %p673_p1, %p672_p0 }
  0x40   :  { %p675_p3 = pnand %p674_p2, %p668_p13 }
  0x42   :  { %678 = shalt.err (!%p675_p3)
}
  0x43   :  { %s737_s0 = smov 128   ;;  %s738_s14 = smov 8  }
  0x44   :  { %45 = dma.hbm_to_vmem [thread:$0]  %s883_s2, 2048, %s805_s22, [#allocation6], %s737_s0, %s737_s0, %s738_s14  }
  0x45   :  { %s739_s16 = smov [#allocation10]   ;;  %s679_s20 = scalar_lea.hbm %s885_s4, 2048 }
  0x46   :  { %s63_s17 = sshll.u32 %s739_s16, 4  ;;  %p680_p4 = scmp.ne.s32.totalorder %s885_s4, %s679_s20  ;;  %s64_s17 = int_to_ptr.vmem [resolvable:$true] %s63_s17 }
  0x47   :  { %p683_p5 = scmp.lt.u32.totalorder %s679_s20, %s885_s4 }
  0x49   :  { %p685_p6 = pnand %p683_p5, %p680_p4 }
  0x4b   :  { %688 = shalt.err (!%p685_p6)
}
  0x4c   :  { %s689_s27 = scalar_lea.vmem %s64_s17, 2048  ;;  %p694_p8 = scmp.lt.s32.totalorder %s64_s17, %s64_s17 }
  0x4d   :  { %p690_p7 = scmp.ne.s32.totalorder %s64_s17, %s689_s27  ;;  %p695_p9 = scmp.lt.s32.totalorder %s689_s27, %s689_s27 }
  0x4f   :  { %p696_p10 = por %p695_p9, %p694_p8 }
  0x51   :  { %p697_p11 = pnand %p696_p10, %p690_p7 }
  0x53   :  { %700 = shalt.err (!%p697_p11)
}
  0x54   :  { %69 = dma.hbm_to_vmem [thread:$0]  %s885_s4, 2048, %s64_s17, [#allocation9], %s737_s0, %s737_s0, %s738_s14  }
  0x55   :  { %723 = dma.done.wait [#allocation3], 128  }
  0x56   :  { %724 = vsyncadd [#allocation3], 4294967168 }
  0x57   :  { %725 = dma.done.wait [#allocation6], 2176  }
  0x58   :  { %726 = vsyncadd [#allocation6], 4294965120 }
  0x59   :  { %727 = dma.done.wait [#allocation9], 6144  }
  0x5a   :  { %728 = vsyncadd [#allocation9], 4294961152  ;;  %v740_v0 = vmov 0.0|0.0   ;;  %vm741_vm0 = vmmov 0   ;;  %v742_v1 = vmov 0.0   ;;  %v87_v2 = vld [vmem:[#allocation7] sm:$0xff] }
  0x5b   :  { %494 = vmatprep.subr.bf16.mxu0 %v740_v0  ;;  %456 = vmatprep.mubr.msk.f32.mxu0 %vm741_vm0, %v742_v1  ;;  %v88_v3 = vld [vmem:[#allocation7 + $0x8] sm:$0xff]  ;;  %v176_v6 = vld [vmem:[#allocation8 + $0x18] sm:$0xff]  ;;  %v173_v7 = vld [vmem:[#allocation8] sm:$0xff]  ;;  %s743_s4 = smov [#allocation11]  }
  0x5c   :  { %269 = vmatprep.mubr.f32.mxu1 %v742_v1  ;;  %v174_v4 = vld [vmem:[#allocation8 + $0x8] sm:$0xff]  ;;  %v495_v5 = vpack.c.bf16 %v88_v3, %v87_v2  ;;  %v175_v8 = vld [vmem:[#allocation8 + $0x10] sm:$0xff]  ;;  %v90_v12 = vld [vmem:[#allocation7 + $0x18] sm:$0xff]  ;;  %s379_s28 = sshll.u32 %s743_s4, 4  ;;  %s380_s28 = int_to_ptr.vmem [resolvable:$true] %s379_s28 }
  0x5d   :  { %v518_v9 = vpack.c.bf16 %v176_v6, %v174_v4  ;;  %v520_v10 = vpack.c.bf16 %v175_v8, %v173_v7  ;;  %v89_v11 = vld [vmem:[#allocation7 + $0x10] sm:$0xff]  ;;  %v178_v13 = vld [vmem:[#allocation8 + $0x28] sm:$0xff]  ;;  %v180_v15 = vld [vmem:[#allocation8 + $0x38] sm:$0xff]  ;;  %s701_s29 = scalar_lea.vmem %s380_s28, 128  ;;  %p706_p13 = scmp.lt.s32.totalorder %s380_s28, %s380_s28 }
  0x5e   :  { %496 = vmatpush3.bf16.msra.mxu0 %v495_v5  ;;  %v498_v14 = vpack.c.bf16 %v90_v12, %v89_v11  ;;  %v177_v16 = vld [vmem:[#allocation8 + $0x20] sm:$0xff]  ;;  %v179_v17 = vld [vmem:[#allocation8 + $0x30] sm:$0xff]  ;;  %v522_v18 = vpack.c.bf16 %v180_v15, %v178_v13  ;;  %v92_v20 = vld [vmem:[#allocation7 + $0x28] sm:$0xff]  ;;  %p702_p12 = scmp.ne.s32.totalorder %s380_s28, %s701_s29  ;;  %p707_p0 = scmp.lt.s32.totalorder %s701_s29, %s701_s29 }
  0x5f   :  { %519 = vmatprep.subr.bf16.mxu1 %v518_v9  ;;  %497 = vmatprep.subr.bf16.mxu0 %v740_v0  ;;  %v91_v19 = vld [vmem:[#allocation7 + $0x20] sm:$0xff]  ;;  %v182_v21 = vld [vmem:[#allocation8 + $0x48] sm:$0xff]  ;;  %v524_v22 = vpack.c.bf16 %v179_v17, %v177_v16  ;;  %v184_v23 = vld [vmem:[#allocation8 + $0x58] sm:$0xff] }
  0x60   :  { %521 = vmatpush1.bf16.msra.mxu1 %v520_v10  ;;  %v526_v24 = vpack.c.bf16 %v184_v23, %v182_v21  ;;  %v181_v25 = vld [vmem:[#allocation8 + $0x40] sm:$0xff]  ;;  %v183_v26 = vld [vmem:[#allocation8 + $0x50] sm:$0xff]  ;;  %v501_v27 = vpack.c.bf16 %v92_v20, %v91_v19  ;;  %v186_v28 = vld [vmem:[#allocation8 + $0x68] sm:$0xff]  ;;  %p708_p1 = por %p707_p0, %p706_p13 }
  0x61   :  { %523 = vmatprep.subr.bf16.mxu1 %v522_v18  ;;  %v188_v29 = vld [vmem:[#allocation8 + $0x78] sm:$0xff]  ;;  %v93_v30 = vld [vmem:[#allocation7 + $0x30] sm:$0xff]  ;;  %v528_v32 = vpack.c.bf16 %v183_v26, %v181_v25  ;;  %v185_v34 = vld [vmem:[#allocation8 + $0x60] sm:$0xff] }
  0x62   :  { %499 = vmatpush3.bf16.msra.mxu0 %v498_v14  ;;  %v94_v31 = vld [vmem:[#allocation7 + $0x38] sm:$0xff]  ;;  %v530_v33 = vpack.c.bf16 %v188_v29, %v186_v28  ;;  %v187_v35 = vld [vmem:[#allocation8 + $0x70] sm:$0xff]  ;;  %v190_v37 = vld [vmem:[#allocation8 + $0x88] sm:$0xff]  ;;  %p709_p2 = pnand %p708_p1, %p702_p12 }
  0x63   :  { %500 = vmatprep.subr.bf16.mxu0 %v740_v0  ;;  %v504_v36 = vpack.c.bf16 %v94_v31, %v93_v30  ;;  %v192_v38 = vld [vmem:[#allocation8 + $0x98] sm:$0xff]  ;;  %v95_v39 = vld [vmem:[#allocation7 + $0x40] sm:$0xff]  ;;  %v96_v40 = vld [vmem:[#allocation7 + $0x48] sm:$0xff]  ;;  %v532_v41 = vpack.c.bf16 %v187_v35, %v185_v34 }
  0x64   :  { %525 = vmatpush1.bf16.msra.mxu1 %v524_v22  ;;  %v534_v42 = vpack.c.bf16 %v192_v38, %v190_v37  ;;  %v189_v43 = vld [vmem:[#allocation8 + $0x80] sm:$0xff]  ;;  %v191_v44 = vld [vmem:[#allocation8 + $0x90] sm:$0xff]  ;;  %v507_v45 = vpack.c.bf16 %v96_v40, %v95_v39  ;;  %v194_v46 = vld [vmem:[#allocation8 + $0xa8] sm:$0xff] }
  0x65   :  { %527 = vmatprep.subr.bf16.mxu1 %v526_v24  ;;  %v196_v47 = vld [vmem:[#allocation8 + $0xb8] sm:$0xff]  ;;  %v97_v48 = vld [vmem:[#allocation7 + $0x50] sm:$0xff]  ;;  %v536_v50 = vpack.c.bf16 %v191_v44, %v189_v43  ;;  %v193_v52 = vld [vmem:[#allocation8 + $0xa0] sm:$0xff] }
  0x66   :  { %502 = vmatpush3.bf16.msra.mxu0 %v501_v27  ;;  %v98_v49 = vld [vmem:[#allocation7 + $0x58] sm:$0xff]  ;;  %v538_v51 = vpack.c.bf16 %v196_v47, %v194_v46  ;;  %v195_v53 = vld [vmem:[#allocation8 + $0xb0] sm:$0xff]  ;;  %v198_v55 = vld [vmem:[#allocation8 + $0xc8] sm:$0xff] }
  0x67   :  { %503 = vmatprep.subr.bf16.mxu0 %v740_v0  ;;  %v510_v54 = vpack.c.bf16 %v98_v49, %v97_v48  ;;  %v200_v56 = vld [vmem:[#allocation8 + $0xd8] sm:$0xff]  ;;  %v99_v57 = vld [vmem:[#allocation7 + $0x60] sm:$0xff]  ;;  %v100_v58 = vld [vmem:[#allocation7 + $0x68] sm:$0xff]  ;;  %v540_v59 = vpack.c.bf16 %v195_v53, %v193_v52 }
  0x68   :  { %529 = vmatpush1.bf16.msra.mxu1 %v528_v32  ;;  %v542_v60 = vpack.c.bf16 %v200_v56, %v198_v55  ;;  %v197_v61 = vld [vmem:[#allocation8 + $0xc0] sm:$0xff]  ;;  %v199_v62 = vld [vmem:[#allocation8 + $0xd0] sm:$0xff]  ;;  %v513_v63 = vpack.c.bf16 %v100_v58, %v99_v57  ;;  %v202_v2 = vld [vmem:[#allocation8 + $0xe8] sm:$0xff] }
  0x69   :  { %531 = vmatprep.subr.bf16.mxu1 %v530_v33  ;;  %v204_v3 = vld [vmem:[#allocation8 + $0xf8] sm:$0xff]  ;;  %v101_v4 = vld [vmem:[#allocation7 + $0x70] sm:$0xff]  ;;  %v544_v6 = vpack.c.bf16 %v199_v62, %v197_v61  ;;  %v201_v8 = vld [vmem:[#allocation8 + $0xe0] sm:$0xff] }
  0x6a   :  { %505 = vmatpush3.bf16.msra.mxu0 %v504_v36  ;;  %v102_v5 = vld [vmem:[#allocation7 + $0x78] sm:$0xff]  ;;  %v546_v7 = vpack.c.bf16 %v204_v3, %v202_v2  ;;  %v203_v9 = vld [vmem:[#allocation8 + $0xf0] sm:$0xff]  ;;  %v282_v14 = vld [vmem:[#allocation10] sm:$0xff] }
  0x6b   :  { %506 = vmatprep.subr.bf16.mxu0 %v740_v0  ;;  %v516_v10 = vpack.c.bf16 %v102_v5, %v101_v4  ;;  %v548_v11 = vpack.c.bf16 %v203_v9, %v201_v8  ;;  %v86_v12 = vld [vmem:[#allocation5] sm:$0xff]  ;;  %v85_v13 = vld [vmem:[#allocation2] sm:$0xff]  ;;  %v283_v15 = vld [vmem:[#allocation10 + $0x8] sm:$0xff] }
  0x6c   :  { %533 = vmatpush1.bf16.msra.mxu1 %v532_v41  ;;  %v284_v16 = vld [vmem:[#allocation10 + $0x10] sm:$0xff]  ;;  %v551_v17 = vpack.c.bf16 %v283_v15, %v282_v14  ;;  %v285_v18 = vld [vmem:[#allocation10 + $0x18] sm:$0xff]  ;;  %v286_v20 = vld [vmem:[#allocation10 + $0x20] sm:$0xff] }
  0x6d   :  { %535 = vmatprep.subr.bf16.mxu1 %v534_v42  ;;  %v554_v19 = vpack.c.bf16 %v285_v18, %v284_v16  ;;  %v287_v21 = vld [vmem:[#allocation10 + $0x28] sm:$0xff]  ;;  %v288_v23 = vld [vmem:[#allocation10 + $0x30] sm:$0xff]  ;;  %v289_v24 = vld [vmem:[#allocation10 + $0x38] sm:$0xff] }
  0x6e   :  { %508 = vmatpush3.bf16.msra.mxu0 %v507_v45  ;;  %v557_v22 = vpack.c.bf16 %v287_v21, %v286_v20  ;;  %v290_v30 = vld [vmem:[#allocation10 + $0x40] sm:$0xff]  ;;  %v291_v31 = vld [vmem:[#allocation10 + $0x48] sm:$0xff]  ;;  %v292_v33 = vld [vmem:[#allocation10 + $0x50] sm:$0xff] }
  0x6f   :  { %509 = vmatprep.subr.bf16.mxu0 %v740_v0  ;;  %v563_v32 = vpack.c.bf16 %v291_v31, %v290_v30  ;;  %v293_v34 = vld [vmem:[#allocation10 + $0x58] sm:$0xff]  ;;  %v294_v36 = vld [vmem:[#allocation10 + $0x60] sm:$0xff]  ;;  %v295_v37 = vld [vmem:[#allocation10 + $0x68] sm:$0xff] }
  0x70   :  { %537 = vmatpush1.bf16.msra.mxu1 %v536_v50  ;;  %v566_v35 = vpack.c.bf16 %v293_v34, %v292_v33  ;;  %v569_v38 = vpack.c.bf16 %v295_v37, %v294_v36  ;;  %v296_v39 = vld [vmem:[#allocation10 + $0x70] sm:$0xff]  ;;  %v297_v40 = vld [vmem:[#allocation10 + $0x78] sm:$0xff] }
  0x71   :  { %539 = vmatprep.subr.bf16.mxu1 %v538_v51  ;;  %v572_v41 = vpack.c.bf16 %v297_v40, %v296_v39 }
  0x72   :  { %511 = vmatpush3.bf16.msra.mxu0 %v510_v54 }
  0x73   :  { %512 = vmatprep.subr.bf16.mxu0 %v740_v0 }
  0x74   :  { %541 = vmatpush1.bf16.msra.mxu1 %v540_v59 }
  0x75   :  { %543 = vmatprep.subr.bf16.mxu1 %v542_v60 }
  0x76   :  { %514 = vmatpush3.bf16.msra.mxu0 %v513_v63 }
  0x77   :  { %515 = vmatprep.subr.bf16.mxu0 %v740_v0 }
  0x78   :  { %545 = vmatpush1.bf16.msra.mxu1 %v544_v6 }
  0x79   :  { %547 = vmatprep.subr.bf16.mxu1 %v546_v7 }
  0x7a   :  { %517 = vmatpush3.bf16.msra.mxu0 %v516_v10 }
  0x7b   :  { %550 = vmatprep.subr.bf16.mxu0 %v740_v0 }
  0x7c   :  { %549 = vmatpush1.bf16.msra.mxu1 %v548_v11 }
  0x7d   :  { %457 = vmatmul.mubr.f32.vlgmr.msra.gmra.mrb[0].mxu0 %v86_v12 }
  0x7e   :  { %491 = vmatprep.mubr.msk.f32.mxu0 %vm741_vm0, %v742_v1  ;;  %552 = vmatpush3.bf16.msra.mxu0 %v551_v17  ;;  %v560_v1 = vpack.c.bf16 %v289_v24, %v288_v23 }
  0x7f   :  { %270 = vmatmul.mubr.f32.vlgmr.msra.gmra.mrb[0].mxu1 %v85_v13  ;;  %553 = vmatprep.subr.bf16.mxu0 %v740_v0 }
  0x82   :  { %555 = vmatpush3.bf16.msra.mxu0 %v554_v19 }
  0x83   :  { %556 = vmatprep.subr.bf16.mxu0 %v740_v0 }
  0x86   :  { %558 = vmatpush3.bf16.msra.mxu0 %v557_v22 }
  0x87   :  { %559 = vmatprep.subr.bf16.mxu0 %v740_v0 }
  0x8a   :  { %561 = vmatpush3.bf16.msra.mxu0 %v560_v1 }
  0x8b   :  { %562 = vmatprep.subr.bf16.mxu0 %v740_v0 }
  0x8e   :  { %564 = vmatpush3.bf16.msra.mxu0 %v563_v32 }
  0x8f   :  { %565 = vmatprep.subr.bf16.mxu0 %v740_v0 }
  0x92   :  { %567 = vmatpush3.bf16.msra.mxu0 %v566_v35 }
  0x93   :  { %568 = vmatprep.subr.bf16.mxu0 %v740_v0 }
  0x96   :  { %570 = vmatpush3.bf16.msra.mxu0 %v569_v38 }
  0x97   :  { %571 = vmatprep.subr.bf16.mxu0 %v740_v0 }
  0x9a   :  { %573 = vmatpush3.bf16.msra.mxu0 %v572_v41 }
 0x150   :  { %v169_v25 = vpop.f32.mrb[0].mxu0 }
 0x151   :  { %v458_v26 = vpop.f32.mrb[1].mxu0 }
 0x152   :  { %v271_v27 = vpop.f32.mrb[0].mxu1 }
 0x153   :  { %v276_v28 = vmul.f32 %v271_v27, %v169_v25  ;;  %v273_v29 = vpop.f32.mrb[1].mxu1 }
 0x155   :  { %277 = vmax.xlane.f32.xlu0 %v276_v28 }
 0x1e2   :  { %v278_v42 = vpop.xlane.xlu0 %277 }
 0x1e3   :  { %v279_v43 = vsub.f32 %v276_v28, %v278_v42 }
 0x1e5   :  { %v280_v44 = vmul.f32 1.442695, %v279_v43 }
 0x1e7   :  { %587 = vpow2.f32 %v280_v44 }
 0x1f1   :  { %v588_v45 = vpop.eup %587 }
 0x1f2   :  { %492 = vmatmul.mubr.f32.vlgmr.msra.gmra.mrb[2].mxu0 %v588_v45 }
 0x2c5   :  { %v364_v46 = vpop.f32.mrb[2].mxu0 }
 0x2c6   :  { %v368_v47 = vmax.f32 %v364_v46, 1e-30  ;;  %v493_v48 = vpop.f32.mrb[3].mxu0 }
 0x2c8   :  { %589 = vrcp.f32 %v368_v47 }
 0x2d2   :  { %v590_v49 = vpop.eup %589 }
 0x2d3   :  { %v370_v50 = vmul.f32 %v590_v49, %v588_v45 }
 0x2d5   :  { %v371_v51 = vmul.f32 %v370_v50, %v273_v29 }
 0x2d7   :  { %372 = vst [vmem:[#allocation11] sm:$0xff] %v371_v51 }
 0x2d8   :  { %712 = shalt.err (!%p709_p2)
}
 0x2d9   :  { %s713_s30 = scalar_lea.hbm %s886_s5, 128 }
 0x2da   :  { %p714_p3 = scmp.ne.s32.totalorder %s886_s5, %s713_s30  ;;  %p717_p4 = scmp.lt.u32.totalorder %s713_s30, %s886_s5 }
 0x2dc   :  { %p719_p5 = pnand %p717_p4, %p714_p3 }
 0x2de   :  { %722 = shalt.err (!%p719_p5)
}
 0x2df   :  { %382 = dma.vmem_to_hbm [thread:$0]  %s380_s28, 128, %s886_s5, [#allocation4]  }
 0x2e0   :  { %729 = dma.done.wait [#allocation4], 128  }
 0x2e1   :  { %730 = vsyncadd [#allocation4], 4294967168 }
 0x2e2   :  { %386 = vsyncpa [#allocation3], 1 }
 0x2e3   :  { %387 = vsyncpa [#allocation6], 1 }
 0x2e4   :  { %388 = vsyncpa [#allocation9], 1 }
 0x2e5   :  { %389 = vsyncpa [#allocation4], 1 }

</bundles_post_ra>
